<compile_context>
chip_gen: v7x
topology: tpu7x:2x2x1
jax: 0.10.0
libtpu: 0.0.40
codegen_flags: <defaults>
</compile_context>

<pallas_src>
import math

import jax
import jax.numpy as jnp
from jax import lax
from jax.experimental import pallas as pl
from jax.experimental.pallas import tpu as pltpu


def _round_up(a, m):
    return ((a + m - 1) // m) * m


def _make_flatten_head_kernel(compute_dtype):
    def kernel(x_ref, w_ref, b_ref, o_ref):
        # x_ref: [tm, nf]  rows of flattened (d_model, patch_num) features
        # w_ref: [Tp, nf]  PyTorch nn.Linear weight layout [out, in]; VMEM-resident
        # b_ref: [1, Tp]   f32 bias
        # o_ref: [tm, Tp]
        xv = x_ref[...].astype(compute_dtype)
        acc = lax.dot_general(
            xv, w_ref[...],
            dimension_numbers=(((1,), (1,)), ((), ())),   # contract last dims: X @ W^T
            preferred_element_type=jnp.float32)
        o_ref[...] = (acc + b_ref[...]).astype(o_ref.dtype)
    return kernel


def flatten_head(x, weight, bias, *, compute_dtype=jnp.bfloat16, tm_max=256):
    """FlattenHead forward.

    x:      [B, n_vars, d_model, patch_num]
    weight: [target_window, nf]   (PyTorch nn.Linear layout, nf = d_model*patch_num)
    bias:   [target_window]
    compute_dtype: operand dtype for the matmul (default bf16: weight cast in the
        wrapper, X tile cast in-kernel). None -> use x.dtype operands (exact).
    returns [B, n_vars, target_window]  (dtype of x)
    """
    B, n_vars, d_model, patch_num = x.shape
    nf = d_model * patch_num
    T = weight.shape[0]
    assert weight.shape[1] == nf

    out_dtype = x.dtype
    cd = jnp.dtype(compute_dtype) if compute_dtype is not None else jnp.dtype(x.dtype)

    M = B * n_vars
    # Flatten(start_dim=-2): row-major over (d_model, patch_num). Reshape is free.
    x_flat = x.reshape(M, nf)

    # Weight/bias prep (small arrays only; X is never copied/padded).
    w = weight.astype(cd)
    Tp = _round_up(T, 128)                    # single lane-dense N tile
    if Tp != T:
        w = jnp.pad(w, ((0, Tp - T), (0, 0)))
    b2 = bias.astype(jnp.float32).reshape(1, T)
    if Tp != T:
        b2 = jnp.pad(b2, ((0, 0), (0, Tp - T)))

    # M tiling only; full-K, single N tile. tm multiple of 8 (or == M for tiny M).
    if M >= tm_max:
        tm = tm_max
    else:
        tm = M                                 # block dim == full array dim is always legal
    m_tiles = pl.cdiv(M, tm)                   # edge block masked by Pallas

    x_item = jnp.dtype(x_flat.dtype).itemsize
    w_item = jnp.dtype(w.dtype).itemsize
    o_item = jnp.dtype(out_dtype).itemsize

    # VMEM budget: double-buffered X tile + resident W + output tiles + bias.
    vmem_est = (2 * tm * nf * x_item
                + 2 * Tp * nf * w_item
                + 2 * tm * Tp * o_item
                + 2 * Tp * 4)
    vmem_limit = max(32 * 1024 * 1024, int(vmem_est * 14) // 10)

    cost = pl.CostEstimate(
        flops=2 * M * nf * T,
        transcendentals=0,
        bytes_accessed=(M * nf * x_item + Tp * nf * w_item
                        + M * Tp * o_item + Tp * 4))

    out = pl.pallas_call(
        _make_flatten_head_kernel(cd),
        out_shape=jax.ShapeDtypeStruct((M, Tp), out_dtype),
        grid=(m_tiles,),
        in_specs=[
            pl.BlockSpec((tm, nf), lambda i: (i, 0)),    # X tile (full K)
            pl.BlockSpec((Tp, nf), lambda i: (0, 0)),    # resident W ([T, nf] layout)
            pl.BlockSpec((1, Tp), lambda i: (0, 0)),     # resident bias
        ],
        out_specs=pl.BlockSpec((tm, Tp), lambda i: (i, 0)),
        compiler_params=pltpu.CompilerParams(
            dimension_semantics=("parallel",),
            vmem_limit_bytes=vmem_limit),
        cost_estimate=cost,
    )(x_flat, w, b2)

    # Dropout with head_dropout=0 (eval mode) is identity.
    # TODO(synk): training-mode dropout (p>0) would need pltpu.prng_* in-kernel.
    return out[:, :T].reshape(B, n_vars, T)


if __name__ == "__main__":
    # Small shapes consistent with the module:
    # B=2, n_vars=4, d_model=16, patch_num=8 -> nf=128, target_window=32
    B, n_vars, d_model, patch_num = 2, 4, 16, 8
    nf = d_model * patch_num
    target_window = 32

    key = jax.random.PRNGKey(0)
    kx, kw, kb = jax.random.split(key, 3)

    x = jax.random.normal(kx, (B, n_vars, d_model, patch_num), dtype=jnp.float32)

    # Deterministic nn.Linear-style init: U(-1/sqrt(nf), 1/sqrt(nf))
    bound = 1.0 / math.sqrt(nf)
    weight = jax.random.uniform(kw, (target_window, nf), jnp.float32, -bound, bound)
    bias = jax.random.uniform(kb, (target_window,), jnp.float32, -bound, bound)

    # Reference in plain JAX (same math, f32).
    y_ref = x.reshape(B, n_vars, nf) @ weight.T + bias

    # Default path: bf16 operands, f32 accumulation.
    y_bf16 = jax.block_until_ready(flatten_head(x, weight, bias))
    assert y_bf16.shape == (B, n_vars, target_window)
    assert jnp.allclose(y_bf16, y_ref, atol=2e-2, rtol=2e-2)

    # Exact path: f32 operands.
    y_f32 = jax.block_until_ready(flatten_head(x, weight, bias, compute_dtype=None))
    assert y_f32.shape == (B, n_vars, target_window)
    assert jnp.allclose(y_f32, y_ref, atol=1e-5, rtol=1e-5)

    print("KERNEL_OK")
</pallas_src>

<mosaic_0001>
module attributes {stable_mosaic.version = 11 : i64} {
  func.func @kernel(%arg0: i32, %arg1: memref<8x128xf32, #tpu.memory_space<vmem>>, %arg2: memref<128x128xbf16, #tpu.memory_space<vmem>>, %arg3: memref<1x128xf32, #tpu.memory_space<vmem>>, %arg4: memref<8x128xf32, #tpu.memory_space<vmem>>) attributes {dimension_semantics = [#tpu.dimension_semantics<parallel>], iteration_bounds = array<i64: 1>, scalar_prefetch = 0 : i64, scratch_operands = 0 : i64, tpu.core_type = #tpu.core_type<tc>, window_params = [{transform_indices = @transform_0, window_bounds = array<i64: 8, 128>}, {pipeline_mode = #tpu.pipeline_mode<synchronous>, transform_indices = @transform_1, window_bounds = array<i64: 128, 128>}, {pipeline_mode = #tpu.pipeline_mode<synchronous>, transform_indices = @transform_2, window_bounds = array<i64: 1, 128>}, {transform_indices = @transform_3, window_bounds = array<i64: 8, 128>}]} {
    %c0 = arith.constant 0 : index
    %c0_0 = arith.constant 0 : index
    %0 = vector.load %arg1[%c0, %c0_0] : memref<8x128xf32, #tpu.memory_space<vmem>>, vector<8x128xf32>
    %1 = arith.truncf %0 : vector<8x128xf32> to vector<8x128xbf16>
    %c0_1 = arith.constant 0 : index
    %c0_2 = arith.constant 0 : index
    %2 = vector.load %arg2[%c0_1, %c0_2] : memref<128x128xbf16, #tpu.memory_space<vmem>>, vector<128x128xbf16>
    %cst = arith.constant dense<0.000000e+00> : vector<8x128xf32>
    %3 = tpu.matmul %1, %2, %cst {dimension_numbers = #tpu.dot_dimension_numbers<[1], [1], [0], [0], [0, 0, 1, 0], [], []>} : vector<8x128xbf16>, vector<128x128xbf16>, vector<8x128xf32> -> vector<8x128xf32>
    %c0_3 = arith.constant 0 : index
    %c0_4 = arith.constant 0 : index
    %4 = vector.load %arg3[%c0_3, %c0_4] : memref<1x128xf32, #tpu.memory_space<vmem>>, vector<1x128xf32>
    %5 = vector.broadcast %4 : vector<1x128xf32> to vector<8x128xf32>
    %6 = arith.addf %3, %5 : vector<8x128xf32>
    %c0_5 = arith.constant 0 : index
    %c0_6 = arith.constant 0 : index
    %7 = vector.load %arg4[%c0_5, %c0_6] : memref<8x128xf32, #tpu.memory_space<vmem>>, vector<8x128xf32>
    tpu.vector_store %arg4[%c0_5, %c0_6], %6 {strides = array<i32>} : memref<8x128xf32, #tpu.memory_space<vmem>>, vector<8x128xf32>,
    return
  }
  func.func @transform_0(%arg0: i32) -> (i32, i32) {
    %c0_i32 = arith.constant 0 : i32
    %c0_i32_0 = arith.constant 0 : i32
    return %arg0, %c0_i32 : i32, i32
  }
  func.func @transform_1(%arg0: i32) -> (i32, i32) {
    %c0_i32 = arith.constant 0 : i32
    %c0_i32_0 = arith.constant 0 : i32
    %c0_i32_1 = arith.constant 0 : i32
    return %c0_i32, %c0_i32_0 : i32, i32
  }
  func.func @transform_2(%arg0: i32) -> (i32, i32) {
    %c0_i32 = arith.constant 0 : i32
    %c0_i32_0 = arith.constant 0 : i32
    %c0_i32_1 = arith.constant 0 : i32
    return %c0_i32, %c0_i32_0 : i32, i32
  }
  func.func @transform_3(%arg0: i32) -> (i32, i32) {
    %c0_i32 = arith.constant 0 : i32
    %c0_i32_0 = arith.constant 0 : i32
    return %arg0, %c0_i32 : i32, i32
  }
}

</mosaic_0001>

<bundles_post_ra>
// kernel: tpu_custom_call.1
= control target key start
LH: loop header
LB: loop body
LE: loop exit
PB: predicated region body
PF: predicated region fallthrough
CT: control target
= control target key end

     0   :  { %8 = vsyncpa [#allocation3], 0  ;;  %s370_s0 = inlined_call_operand.hbm [shape: f32[8,128], index: 0, kind: input, shape index: {}]   ;;  %s371_s1 = inlined_call_operand.hbm [shape: bf16[128,128], index: 1, kind: input, shape index: {}]   ;;  %s372_s2 = inlined_call_operand.vmem [shape: f32[1,128], index: 2, kind: input, shape index: {}]   ;;  %s373_s3 = inlined_call_operand.hbm [shape: f32[8,128], index: 3, kind: output, shape index: {}]  }
   0x1   :  { %9 = vsyncpa [#allocation6], 0 }
   0x2   :  { %10 = vsyncpa [#allocation4], 0  ;;  %s297_s12 = smov [#allocation2]   ;;  %s298_s14 = smov [#allocation5]  }
   0x3   :  { %s17_s13 = sshll.u32 %s297_s12, 4  ;;  %s26_s15 = sshll.u32 %s298_s14, 4  ;;  %s18_s13 = int_to_ptr.vmem [resolvable:$true] %s17_s13  ;;  %s324_s15 = int_to_ptr.vmem [resolvable:$true] %s26_s15 }
   0x4   :  { %s225_s18 = scalar_lea.hbm %s370_s0, 128 }
   0x5   :  { %p226_p0 = scmp.ne.s32.totalorder %s370_s0, %s225_s18  ;;  %p229_p1 = scmp.lt.u32.totalorder %s225_s18, %s370_s0 }
   0x7   :  { %p231_p2 = pnand %p229_p1, %p226_p0 }
   0x9   :  { %234 = shalt.err (!%p231_p2)
}
   0xa   :  { %s235_s23 = scalar_lea.vmem %s18_s13, 128  ;;  %p240_p4 = scmp.lt.s32.totalorder %s18_s13, %s18_s13 }
   0xb   :  { %p236_p3 = scmp.ne.s32.totalorder %s18_s13, %s235_s23  ;;  %p241_p5 = scmp.lt.s32.totalorder %s235_s23, %s235_s23 }
   0xd   :  { %p242_p6 = por %p241_p5, %p240_p4 }
   0xf   :  { %p243_p7 = pnand %p242_p6, %p236_p3 }
  0x11   :  { %246 = shalt.err (!%p243_p7)
}
  0x12   :  { %20 = dma.hbm_to_vmem [thread:$0]  %s370_s0, 128, %s18_s13, [#allocation3]  }
  0x13   :  { %s247_s28 = scalar_lea.hbm %s371_s1, 1024 }
  0x14   :  { %p248_p8 = scmp.ne.s32.totalorder %s371_s1, %s247_s28  ;;  %p251_p9 = scmp.lt.u32.totalorder %s247_s28, %s371_s1 }
  0x16   :  { %p253_p10 = pnand %p251_p9, %p248_p8 }
  0x18   :  { %256 = shalt.err (!%p253_p10)
}
  0x19   :  { %s257_s6 = scalar_lea.vmem %s324_s15, 1024  ;;  %p262_p12 = scmp.lt.s32.totalorder %s324_s15, %s324_s15 }
  0x1a   :  { %p258_p11 = scmp.ne.s32.totalorder %s324_s15, %s257_s6  ;;  %p263_p13 = scmp.lt.s32.totalorder %s257_s6, %s257_s6 }
  0x1c   :  { %p264_p0 = por %p263_p13, %p262_p12 }
  0x1e   :  { %p265_p1 = pnand %p264_p0, %p258_p11 }
  0x20   :  { %268 = shalt.err (!%p265_p1)
}
  0x21   :  { %s299_s0 = smov 64   ;;  %s300_s7 = smov 4  }
  0x22   :  { %32 = dma.hbm_to_vmem [thread:$0]  %s371_s1, 1024, %s324_s15, [#allocation6], %s299_s0, %s299_s0, %s300_s7  }
  0x23   :  { %291 = dma.done.wait [#allocation3], 128  }
  0x24   :  { %292 = vsyncadd [#allocation3], 4294967168 }
  0x25   :  { %293 = dma.done.wait [#allocation6], 1024  }
  0x26   :  { %294 = vsyncadd [#allocation6], 4294966272  ;;  %v301_v0 = vmov 0.0   ;;  %vm302_vm0 = vmmov 0   ;;  %v217_v1 = vld [vmem:[#allocation5] sm:$0xff]   ;;  %v218_v2 = vld [vmem:[#allocation5 + $0x8] sm:$0xff]  }
  0x27   :  { %190 = vmatprep.subr.bf16.mxu0 %v301_v0  ;;  %206 = vmatprep.mubr.msk.bf16.mxu0 %vm302_vm0, %v301_v0  ;;  %v219_v3 = vld [vmem:[#allocation5 + $0x10] sm:$0xff]   ;;  %v220_v4 = vld [vmem:[#allocation5 + $0x18] sm:$0xff]   ;;  %v221_v5 = vld [vmem:[#allocation5 + $0x20] sm:$0xff]   ;;  %s303_s11 = smov [#allocation7]  }
  0x28   :  { %191 = vmatpush3.bf16.xpose.msra.mxu0 %v217_v1  ;;  %v222_v6 = vld [vmem:[#allocation5 + $0x28] sm:$0xff]   ;;  %v223_v7 = vld [vmem:[#allocation5 + $0x30] sm:$0xff]   ;;  %v224_v8 = vld [vmem:[#allocation5 + $0x38] sm:$0xff]   ;;  %s162_s12 = sshll.u32 %s303_s11, 4  ;;  %s163_s12 = int_to_ptr.vmem [resolvable:$true] %s162_s12 }
  0x29   :  { %192 = vmatprep.subr.bf16.mxu0 %v301_v0  ;;  %v42_v9 = vld [vmem:[#allocation2] sm:$0xff]  ;;  %s269_s13 = scalar_lea.vmem %s163_s12, 128  ;;  %p274_p3 = scmp.lt.s32.totalorder %s163_s12, %s163_s12 }
  0x2a   :  { %v43_v10 = vpack.c.bf16 %v42_v9, %v42_v9  ;;  %v172_v11 = vld [vmem:[%s372_s2] ss:$0 sm:$0xff]  ;;  %p270_p2 = scmp.ne.s32.totalorder %s163_s12, %s269_s13  ;;  %p275_p4 = scmp.lt.s32.totalorder %s269_s13, %s269_s13 }
  0x2c   :  { %p276_p5 = por %p275_p4, %p274_p3 }
  0x2e   :  { %p277_p6 = pnand %p276_p5, %p270_p2 }
  0x30   :  { %193 = vmatpush3.bf16.xpose.msra.mxu0 %v218_v2 }
  0x31   :  { %194 = vmatprep.subr.bf16.mxu0 %v301_v0 }
  0x38   :  { %195 = vmatpush3.bf16.xpose.msra.mxu0 %v219_v3 }
  0x39   :  { %196 = vmatprep.subr.bf16.mxu0 %v301_v0 }
  0x40   :  { %197 = vmatpush3.bf16.xpose.msra.mxu0 %v220_v4 }
  0x41   :  { %198 = vmatprep.subr.bf16.mxu0 %v301_v0 }
  0x48   :  { %199 = vmatpush3.bf16.xpose.msra.mxu0 %v221_v5 }
  0x49   :  { %200 = vmatprep.subr.bf16.mxu0 %v301_v0 }
  0x50   :  { %201 = vmatpush3.bf16.xpose.msra.mxu0 %v222_v6 }
  0x51   :  { %202 = vmatprep.subr.bf16.mxu0 %v301_v0 }
  0x58   :  { %203 = vmatpush3.bf16.xpose.msra.mxu0 %v223_v7 }
  0x59   :  { %204 = vmatprep.subr.bf16.mxu0 %v301_v0 }
  0x60   :  { %205 = vmatpush3.bf16.xpose.msra.mxu0 %v224_v8 }
  0x67   :  { %207 = vmatmul.mubr.bf16.vlgmr.msra.gmra.mrb[0].mxu0 %v43_v10 }
 0x13a   :  { %v149_v12 = vpop.f32.mrb[0].mxu0 }
 0x13b   :  { %v150_v13 = vadd.f32 %v172_v11, %v149_v12  ;;  %v208_v14 = vpop.f32.mrb[1].mxu0 }
 0x13c   :  { %v152_v15 = vpop.f32.mrb[2].mxu0 }
 0x13d   :  { %155 = vst [vmem:[#allocation7] sm:$0xff] %v150_v13  ;;  %v209_v16 = vpop.f32.mrb[3].mxu0 }
 0x13e   :  { %280 = shalt.err (!%p277_p6)
}
 0x13f   :  { %s281_s2 = scalar_lea.hbm %s373_s3, 128 }
 0x140   :  { %p282_p7 = scmp.ne.s32.totalorder %s373_s3, %s281_s2  ;;  %p285_p8 = scmp.lt.u32.totalorder %s281_s2, %s373_s3 }
 0x142   :  { %p287_p9 = pnand %p285_p8, %p282_p7 }
 0x144   :  { %290 = shalt.err (!%p287_p9)
}
 0x145   :  { %165 = dma.vmem_to_hbm [thread:$0]  %s163_s12, 128, %s373_s3, [#allocation4]  }
 0x146   :  { %295 = dma.done.wait [#allocation4], 128  }
 0x147   :  { %296 = vsyncadd [#allocation4], 4294967168 }
 0x148   :  { %169 = vsyncpa [#allocation3], 1 }
 0x149   :  { %170 = vsyncpa [#allocation6], 1 }
 0x14a   :  { %171 = vsyncpa [#allocation4], 1 }

</bundles_post_ra>
